<compile_context>
chip_gen: v5e
topology: v5e:2x2
jax: 0.10.0
libtpu: 0.0.40
codegen_flags: <defaults>
</compile_context>

<pallas_src>
import numpy as np
import jax
import jax.numpy as jnp
from jax import lax
from jax.experimental import pallas as pl
from jax.experimental.pallas import tpu as pltpu

H = W = 3                 # tic-tac-toe board
F_IN = 3 * H * W          # 27  (flattened NCHW input features)
F_IN_PAD = 32             # padded contraction dim (multiple of 8 sublanes)
F_CONV = 16 * H * W       # 144 (conv feature width, flattened)
F_FC = 32                 # fc hidden width


# ----------------------------------------------------------------------------
# Pallas kernel: entire hot path on one (features, batch_tile) activation slab.
# ----------------------------------------------------------------------------
def tictac_kernel(x_ref, w1_ref, b1_ref, w2_ref, b2_ref, w3_ref, b3_ref,
                  w4_ref, b4_ref, w5_ref, b5_ref, o_ref):
    x = x_ref[...]                                                       # (32, TB)
    h = jnp.dot(w1_ref[...], x, preferred_element_type=jnp.float32)
    h = jnp.maximum(h + b1_ref[...], 0.0)                                # conv1+ReLU (144, TB)
    h = jnp.dot(w2_ref[...], h, preferred_element_type=jnp.float32)
    h = jnp.maximum(h + b2_ref[...], 0.0)                                # conv2+ReLU (144, TB)
    h = jnp.dot(w3_ref[...], h, preferred_element_type=jnp.float32)
    h = jnp.maximum(h + b3_ref[...], 0.0)                                # fc1+ReLU   (32, TB)
    h = jnp.dot(w4_ref[...], h, preferred_element_type=jnp.float32)
    h = jnp.maximum(h + b4_ref[...], 0.0)                                # fc2+ReLU   (32, TB)
    # fc3 has N=1: VPU broadcast-multiply + sublane reduce instead of an MXU pass.
    out = jnp.sum(h * w5_ref[...], axis=0, keepdims=True) + b5_ref[...]  # (1, TB)
    o_ref[...] = jnp.tanh(out)                                           # lane-dense store


def _round_up(n, m):
    return ((n + m - 1) // m) * m


def tictac_forward(x_flat, params, *, tb=2048):
    """x_flat: (B, 27) float32 (torch Flatten order of NCHW). Returns (B, 1) f32."""
    B = x_flat.shape[0]
    tb = min(tb, _round_up(B, 128))          # lane-aligned batch tile
    B_pad = _round_up(B, tb)
    grid = (B_pad // tb,)

    # Layout plumbing in the wrapper (not in-kernel): (B,27) -> zero-padded (32, B_pad).
    x_t = jnp.zeros((F_IN_PAD, B_pad), jnp.float32)
    x_t = x_t.at[:F_IN, :B].set(x_flat.astype(jnp.float32).T)

    x_spec = pl.BlockSpec((F_IN_PAD, tb), lambda i: (0, i))
    out_spec = pl.BlockSpec((1, tb), lambda i: (0, i))
    # Weights/biases: full-array blocks with constant index_map -> VMEM-resident
    # across all batch tiles (DMA'd once).
    param_specs = [pl.BlockSpec(p.shape, lambda i: (0, 0)) for p in params]

    flops_per_row = 2 * (F_IN_PAD * F_CONV + F_CONV * F_CONV
                         + F_CONV * F_FC + F_FC * F_FC + F_FC)
    weight_bytes = sum(int(np.prod(p.shape)) * 4 for p in params)
    cost = pl.CostEstimate(flops=flops_per_row * B_pad,
                           transcendentals=B_pad,
                           bytes_accessed=B_pad * (F_IN_PAD + 1) * 4 + weight_bytes)

    out_t = pl.pallas_call(
        tictac_kernel,
        out_shape=jax.ShapeDtypeStruct((1, B_pad), jnp.float32),
        grid_spec=pltpu.PrefetchScalarGridSpec(
            num_scalar_prefetch=0,
            grid=grid,
            in_specs=[x_spec] + param_specs,
            out_specs=out_spec),
        compiler_params=pltpu.CompilerParams(
            dimension_semantics=("parallel",)),   # v7x: shard batch tiles across 2 TCs
        cost_estimate=cost,
    )(x_t, *params)

    return out_t[:, :B].T                         # (B, 1)


# ----------------------------------------------------------------------------
# Glue: deterministic parameter init + conv -> dense-matrix lowering (transposed).
# ----------------------------------------------------------------------------
def uniform_init(key, shape, fan_in):
    bound = 1.0 / np.sqrt(fan_in)
    return jax.random.uniform(key, shape, jnp.float32, -bound, bound)


def conv3x3_to_dense(w, b):
    """Lower Conv2d(Cin->Cout, k=3, pad=1) on a 3x3 board to a dense matrix.

    Returns M (Cin*9, Cout*9), b_dense (Cout*9,) with
      flatten(conv(x)) = flatten(x) @ M + b_dense   (row-major C,H,W flattening).
    """
    w = np.asarray(w)
    b = np.asarray(b)
    Cout, Cin, KH, KW = w.shape
    M = np.zeros((Cin * H * W, Cout * H * W), dtype=np.float32)
    for co in range(Cout):
        for oi in range(H):
            for oj in range(W):
                out_idx = co * H * W + oi * W + oj
                for ci in range(Cin):
                    for ki in range(KH):
                        for kj in range(KW):
                            ii = oi + ki - 1
                            jj = oj + kj - 1
                            if 0 <= ii < H and 0 <= jj < W:
                                in_idx = ci * H * W + ii * W + jj
                                M[in_idx, out_idx] = w[co, ci, ki, kj]
    b_dense = np.repeat(b, H * W).astype(np.float32)
    return jnp.asarray(M), jnp.asarray(b_dense)


def make_params(key):
    ks = jax.random.split(key, 10)
    cw1 = uniform_init(ks[0], (16, 3, 3, 3), 3 * 9)     # Conv2d(3, 16, 3, pad=1)
    cb1 = uniform_init(ks[1], (16,), 3 * 9)
    cw2 = uniform_init(ks[2], (16, 16, 3, 3), 16 * 9)   # Conv2d(16, 16, 3, pad=1)
    cb2 = uniform_init(ks[3], (16,), 16 * 9)
    lw3 = uniform_init(ks[4], (32, 144), 144)           # Linear(144, 32)
    lb3 = uniform_init(ks[5], (32,), 144)
    lw4 = uniform_init(ks[6], (32, 32), 32)              # Linear(32, 32)
    lb4 = uniform_init(ks[7], (32,), 32)
    lw5 = uniform_init(ks[8], (1, 32), 32)                # Linear(32, 1)
    lb5 = uniform_init(ks[9], (1,), 32)
    return (cw1, cb1, cw2, cb2, lw3, lb3, lw4, lb4, lw5, lb5)


def lower_params(raw):
    """Produce transposed, padding-aligned kernel params for (features, batch) layout."""
    cw1, cb1, cw2, cb2, lw3, lb3, lw4, lb4, lw5, lb5 = raw
    w1d, b1d = conv3x3_to_dense(cw1, cb1)        # (27, 144), (144,)
    w2d, b2d = conv3x3_to_dense(cw2, cb2)        # (144, 144), (144,)
    # Pad the K=27 contraction once to 32 (zeros) for clean sublane tiling.
    w1t = jnp.zeros((F_CONV, F_IN_PAD), jnp.float32).at[:, :F_IN].set(w1d.T)
    return (
        w1t, b1d.reshape(-1, 1),                 # (144, 32), (144, 1)
        w2d.T, b2d.reshape(-1, 1),               # (144, 144), (144, 1)
        lw3, lb3.reshape(-1, 1),                 # (32, 144),  (32, 1)
        lw4, lb4.reshape(-1, 1),                 # (32, 32),   (32, 1)
        lw5.reshape(-1, 1), lb5.reshape(1, 1),   # (32, 1),    (1, 1)
    )


# ----------------------------------------------------------------------------
# Pure-JAX reference (mirrors the PyTorch module exactly) for verification.
# ----------------------------------------------------------------------------
def reference_forward(x, raw):
    cw1, cb1, cw2, cb2, lw3, lb3, lw4, lb4, lw5, lb5 = raw
    dn = ('NCHW', 'OIHW', 'NCHW')
    y = lax.conv_general_dilated(x, cw1, (1, 1), 'SAME', dimension_numbers=dn)
    y = jnp.maximum(y + cb1[None, :, None, None], 0.0)
    y = lax.conv_general_dilated(y, cw2, (1, 1), 'SAME', dimension_numbers=dn)
    y = jnp.maximum(y + cb2[None, :, None, None], 0.0)
    y = y.reshape(y.shape[0], -1)
    y = jnp.maximum(y @ lw3.T + lb3, 0.0)
    y = jnp.maximum(y @ lw4.T + lb4, 0.0)
    return jnp.tanh(y @ lw5.T + lb5)


if __name__ == "__main__":
    key = jax.random.PRNGKey(0)
    kx, kp = jax.random.split(key)

    B = 8
    x = jax.random.normal(kx, (B, 3, H, W), dtype=jnp.float32)   # NCHW input

    raw_params = make_params(kp)
    kernel_params = lower_params(raw_params)

    x_flat = x.reshape(B, 3 * H * W)                             # torch Flatten order
    out = tictac_forward(x_flat, kernel_params)
    out = jax.block_until_ready(out)

    ref = reference_forward(x, raw_params)
    assert out.shape == (B, 1)
    np.testing.assert_allclose(np.asarray(out), np.asarray(ref), rtol=1e-5, atol=1e-5)

    print("KERNEL_OK")
</pallas_src>

<mosaic_0001>
module attributes {stable_mosaic.version = 11 : i64} {
  func.func @tictac_kernel(%arg0: i32, %arg1: memref<32x128xf32, #tpu.memory_space<vmem>>, %arg2: memref<144x32xf32, #tpu.memory_space<vmem>>, %arg3: memref<144x1xf32, #tpu.memory_space<vmem>>, %arg4: memref<144x144xf32, #tpu.memory_space<vmem>>, %arg5: memref<144x1xf32, #tpu.memory_space<vmem>>, %arg6: memref<32x144xf32, #tpu.memory_space<vmem>>, %arg7: memref<32x1xf32, #tpu.memory_space<vmem>>, %arg8: memref<32x32xf32, #tpu.memory_space<vmem>>, %arg9: memref<32x1xf32, #tpu.memory_space<vmem>>, %arg10: memref<32x1xf32, #tpu.memory_space<vmem>>, %arg11: memref<1x1xf32, #tpu.memory_space<vmem>>, %arg12: memref<1x128xf32, #tpu.memory_space<vmem>>) attributes {dimension_semantics = [#tpu.dimension_semantics<parallel>], iteration_bounds = array<i64: 1>, scalar_prefetch = 0 : i64, scratch_operands = 0 : i64, tpu.core_type = #tpu.core_type<tc>, window_params = [{transform_indices = @transform_0, window_bounds = array<i64: 32, 128>}, {pipeline_mode = #tpu.pipeline_mode<synchronous>, transform_indices = @transform_1, window_bounds = array<i64: 144, 32>}, {pipeline_mode = #tpu.pipeline_mode<synchronous>, transform_indices = @transform_2, window_bounds = array<i64: 144, 1>}, {pipeline_mode = #tpu.pipeline_mode<synchronous>, transform_indices = @transform_3, window_bounds = array<i64: 144, 144>}, {pipeline_mode = #tpu.pipeline_mode<synchronous>, transform_indices = @transform_4, window_bounds = array<i64: 144, 1>}, {pipeline_mode = #tpu.pipeline_mode<synchronous>, transform_indices = @transform_5, window_bounds = array<i64: 32, 144>}, {pipeline_mode = #tpu.pipeline_mode<synchronous>, transform_indices = @transform_6, window_bounds = array<i64: 32, 1>}, {pipeline_mode = #tpu.pipeline_mode<synchronous>, transform_indices = @transform_7, window_bounds = array<i64: 32, 32>}, {pipeline_mode = #tpu.pipeline_mode<synchronous>, transform_indices = @transform_8, window_bounds = array<i64: 32, 1>}, {pipeline_mode = #tpu.pipeline_mode<synchronous>, transform_indices = @transform_9, window_bounds = array<i64: 32, 1>}, {pipeline_mode = #tpu.pipeline_mode<synchronous>, transform_indices = @transform_10, window_bounds = array<i64: 1, 1>}, {transform_indices = @transform_11, window_bounds = array<i64: 1, 128>}]} {
    %c0 = arith.constant 0 : index
    %c0_0 = arith.constant 0 : index
    %0 = vector.load %arg1[%c0, %c0_0] : memref<32x128xf32, #tpu.memory_space<vmem>>, vector<32x128xf32>
    %c0_1 = arith.constant 0 : index
    %c0_2 = arith.constant 0 : index
    %1 = vector.load %arg2[%c0_1, %c0_2] : memref<144x32xf32, #tpu.memory_space<vmem>>, vector<144x32xf32>
    %cst = arith.constant dense<0.000000e+00> : vector<144x128xf32>
    %2 = tpu.matmul %1, %0, %cst {dimension_numbers = #tpu.dot_dimension_numbers<[1], [0], [0], [1], [0, 0, 1, 1], [], []>} : vector<144x32xf32>, vector<32x128xf32>, vector<144x128xf32> -> vector<144x128xf32>
    %c0_3 = arith.constant 0 : index
    %c0_4 = arith.constant 0 : index
    %3 = vector.load %arg3[%c0_3, %c0_4] : memref<144x1xf32, #tpu.memory_space<vmem>>, vector<144x1xf32>
    %4 = vector.broadcast %3 : vector<144x1xf32> to vector<144x128xf32>
    %5 = arith.addf %2, %4 : vector<144x128xf32>
    %cst_5 = arith.constant 0.000000e+00 : f32
    %6 = vector.broadcast %cst_5 : f32 to vector<144x128xf32>
    %7 = arith.maximumf %5, %6 : vector<144x128xf32>
    %c0_6 = arith.constant 0 : index
    %c0_7 = arith.constant 0 : index
    %8 = vector.load %arg4[%c0_6, %c0_7] : memref<144x144xf32, #tpu.memory_space<vmem>>, vector<144x144xf32>
    %cst_8 = arith.constant dense<0.000000e+00> : vector<144x128xf32>
    %9 = tpu.matmul %8, %7, %cst_8 {dimension_numbers = #tpu.dot_dimension_numbers<[1], [0], [0], [1], [0, 0, 1, 1], [], []>} : vector<144x144xf32>, vector<144x128xf32>, vector<144x128xf32> -> vector<144x128xf32>
    %c0_9 = arith.constant 0 : index
    %c0_10 = arith.constant 0 : index
    %10 = vector.load %arg5[%c0_9, %c0_10] : memref<144x1xf32, #tpu.memory_space<vmem>>, vector<144x1xf32>
    %11 = vector.broadcast %10 : vector<144x1xf32> to vector<144x128xf32>
    %12 = arith.addf %9, %11 : vector<144x128xf32>
    %cst_11 = arith.constant 0.000000e+00 : f32
    %13 = vector.broadcast %cst_11 : f32 to vector<144x128xf32>
    %14 = arith.maximumf %12, %13 : vector<144x128xf32>
    %c0_12 = arith.constant 0 : index
    %c0_13 = arith.constant 0 : index
    %15 = vector.load %arg6[%c0_12, %c0_13] : memref<32x144xf32, #tpu.memory_space<vmem>>, vector<32x144xf32>
    %cst_14 = arith.constant dense<0.000000e+00> : vector<32x128xf32>
    %16 = tpu.matmul %15, %14, %cst_14 {dimension_numbers = #tpu.dot_dimension_numbers<[1], [0], [0], [1], [0, 0, 1, 1], [], []>} : vector<32x144xf32>, vector<144x128xf32>, vector<32x128xf32> -> vector<32x128xf32>
    %c0_15 = arith.constant 0 : index
    %c0_16 = arith.constant 0 : index
    %17 = vector.load %arg7[%c0_15, %c0_16] : memref<32x1xf32, #tpu.memory_space<vmem>>, vector<32x1xf32>
    %18 = vector.broadcast %17 : vector<32x1xf32> to vector<32x128xf32>
    %19 = arith.addf %16, %18 : vector<32x128xf32>
    %cst_17 = arith.constant 0.000000e+00 : f32
    %20 = vector.broadcast %cst_17 : f32 to vector<32x128xf32>
    %21 = arith.maximumf %19, %20 : vector<32x128xf32>
    %c0_18 = arith.constant 0 : index
    %c0_19 = arith.constant 0 : index
    %22 = vector.load %arg8[%c0_18, %c0_19] : memref<32x32xf32, #tpu.memory_space<vmem>>, vector<32x32xf32>
    %cst_20 = arith.constant dense<0.000000e+00> : vector<32x128xf32>
    %23 = tpu.matmul %22, %21, %cst_20 {dimension_numbers = #tpu.dot_dimension_numbers<[1], [0], [0], [1], [0, 0, 1, 1], [], []>} : vector<32x32xf32>, vector<32x128xf32>, vector<32x128xf32> -> vector<32x128xf32>
    %c0_21 = arith.constant 0 : index
    %c0_22 = arith.constant 0 : index
    %24 = vector.load %arg9[%c0_21, %c0_22] : memref<32x1xf32, #tpu.memory_space<vmem>>, vector<32x1xf32>
    %25 = vector.broadcast %24 : vector<32x1xf32> to vector<32x128xf32>
    %26 = arith.addf %23, %25 : vector<32x128xf32>
    %cst_23 = arith.constant 0.000000e+00 : f32
    %27 = vector.broadcast %cst_23 : f32 to vector<32x128xf32>
    %28 = arith.maximumf %26, %27 : vector<32x128xf32>
    %c0_24 = arith.constant 0 : index
    %c0_25 = arith.constant 0 : index
    %29 = vector.load %arg10[%c0_24, %c0_25] : memref<32x1xf32, #tpu.memory_space<vmem>>, vector<32x1xf32>
    %30 = vector.broadcast %29 : vector<32x1xf32> to vector<32x128xf32>
    %31 = arith.mulf %28, %30 : vector<32x128xf32>
    %cst_26 = arith.constant dense<0.000000e+00> : vector<128xf32>
    %32 = vector.multi_reduction <add>, %31, %cst_26 [0] : vector<32x128xf32> to vector<128xf32>
    %33 = vector.shape_cast %32 : vector<128xf32> to vector<1x128xf32>
    %c0_27 = arith.constant 0 : index
    %c0_28 = arith.constant 0 : index
    %34 = vector.load %arg11[%c0_27, %c0_28] : memref<1x1xf32, #tpu.memory_space<vmem>>, vector<1x1xf32>
    %35 = vector.broadcast %34 : vector<1x1xf32> to vector<1x128xf32>
    %36 = arith.addf %33, %35 : vector<1x128xf32>
    %37 = math.tanh %36 : vector<1x128xf32>
    %c0_29 = arith.constant 0 : index
    %c0_30 = arith.constant 0 : index
    %38 = vector.load %arg12[%c0_29, %c0_30] : memref<1x128xf32, #tpu.memory_space<vmem>>, vector<1x128xf32>
    tpu.vector_store %arg12[%c0_29, %c0_30], %37 {strides = array<i32>} : memref<1x128xf32, #tpu.memory_space<vmem>>, vector<1x128xf32>,
    return
  }
  func.func @transform_0(%arg0: i32) -> (i32, i32) {
    %c0_i32 = arith.constant 0 : i32
    %c0_i32_0 = arith.constant 0 : i32
    return %c0_i32, %arg0 : i32, i32
  }
  func.func @transform_1(%arg0: i32) -> (i32, i32) {
    %c0_i32 = arith.constant 0 : i32
    %c0_i32_0 = arith.constant 0 : i32
    %c0_i32_1 = arith.constant 0 : i32
    return %c0_i32, %c0_i32_0 : i32, i32
  }
  func.func @transform_2(%arg0: i32) -> (i32, i32) {
    %c0_i32 = arith.constant 0 : i32
    %c0_i32_0 = arith.constant 0 : i32
    %c0_i32_1 = arith.constant 0 : i32
    return %c0_i32, %c0_i32_0 : i32, i32
  }
  func.func @transform_3(%arg0: i32) -> (i32, i32) {
    %c0_i32 = arith.constant 0 : i32
    %c0_i32_0 = arith.constant 0 : i32
    %c0_i32_1 = arith.constant 0 : i32
    return %c0_i32, %c0_i32_0 : i32, i32
  }
  func.func @transform_4(%arg0: i32) -> (i32, i32) {
    %c0_i32 = arith.constant 0 : i32
    %c0_i32_0 = arith.constant 0 : i32
    %c0_i32_1 = arith.constant 0 : i32
    return %c0_i32, %c0_i32_0 : i32, i32
  }
  func.func @transform_5(%arg0: i32) -> (i32, i32) {
    %c0_i32 = arith.constant 0 : i32
    %c0_i32_0 = arith.constant 0 : i32
    %c0_i32_1 = arith.constant 0 : i32
    return %c0_i32, %c0_i32_0 : i32, i32
  }
  func.func @transform_6(%arg0: i32) -> (i32, i32) {
    %c0_i32 = arith.constant 0 : i32
    %c0_i32_0 = arith.constant 0 : i32
    %c0_i32_1 = arith.constant 0 : i32
    return %c0_i32, %c0_i32_0 : i32, i32
  }
  func.func @transform_7(%arg0: i32) -> (i32, i32) {
    %c0_i32 = arith.constant 0 : i32
    %c0_i32_0 = arith.constant 0 : i32
    %c0_i32_1 = arith.constant 0 : i32
    return %c0_i32, %c0_i32_0 : i32, i32
  }
  func.func @transform_8(%arg0: i32) -> (i32, i32) {
    %c0_i32 = arith.constant 0 : i32
    %c0_i32_0 = arith.constant 0 : i32
    %c0_i32_1 = arith.constant 0 : i32
    return %c0_i32, %c0_i32_0 : i32, i32
  }
  func.func @transform_9(%arg0: i32) -> (i32, i32) {
    %c0_i32 = arith.constant 0 : i32
    %c0_i32_0 = arith.constant 0 : i32
    %c0_i32_1 = arith.constant 0 : i32
    return %c0_i32, %c0_i32_0 : i32, i32
  }
  func.func @transform_10(%arg0: i32) -> (i32, i32) {
    %c0_i32 = arith.constant 0 : i32
    %c0_i32_0 = arith.constant 0 : i32
    %c0_i32_1 = arith.constant 0 : i32
    return %c0_i32, %c0_i32_0 : i32, i32
  }
  func.func @transform_11(%arg0: i32) -> (i32, i32) {
    %c0_i32 = arith.constant 0 : i32
    %c0_i32_0 = arith.constant 0 : i32
    return %c0_i32, %arg0 : i32, i32
  }
}

</mosaic_0001>

<bundles_post_ra>
// kernel: tpu_custom_call.1
= control target key start
LH: loop header
LB: loop body
LE: loop exit
PB: predicated region body
PF: predicated region fallthrough
CT: control target
= control target key end

     0   :  { %s1510_s0 = inlined_call_operand.vmem [shape: f32[32,128], index: 0, kind: input, shape index: {}]   ;;  %s1511_s1 = inlined_call_operand.vmem [shape: f32[144,32], index: 1, kind: input, shape index: {}]   ;;  %s1512_s2 = inlined_call_operand.vmem [shape: f32[144,1], index: 2, kind: input, shape index: {}]   ;;  %s1513_s3 = inlined_call_operand.vmem [shape: f32[144,144], index: 3, kind: input, shape index: {}]   ;;  %s1514_s4 = inlined_call_operand.vmem [shape: f32[144,1], index: 4, kind: input, shape index: {}]   ;;  %s1515_s5 = inlined_call_operand.vmem [shape: f32[32,144], index: 5, kind: input, shape index: {}]   ;;  %s1516_s6 = inlined_call_operand.vmem [shape: f32[32,1], index: 6, kind: input, shape index: {}]   ;;  %s1517_s7 = inlined_call_operand.vmem [shape: f32[32,32], index: 7, kind: input, shape index: {}]   ;;  %s1518_s8 = inlined_call_operand.vmem [shape: f32[32,1], index: 8, kind: input, shape index: {}]   ;;  %s1519_s9 = inlined_call_operand.vmem [shape: f32[32,1], index: 9, kind: input, shape index: {}]   ;;  %s1520_s10 = inlined_call_operand.<no memory space> [shape: f32[1,1], index: 10, kind: input, shape index: {}]   ;;  %s1521_s11 = inlined_call_operand.hbm [shape: f32[1,128], index: 11, kind: output, shape index: {}]  }
   0x1   :  { %v16_v0 = vstv %s1520_s10 }
   0x2   :  { %17 = vst [vmem:[#allocation2] sm:$0x1] %v16_v0 }
   0x3   :  { %v44_v1 = vld [vmem:[%s1510_s0 + $0x18] sm:$0xff]  ;;  %v76_v3 = vld [vmem:[%s1512_s2 + $0x68] sm:$0xff]  ;;  %v993_v4 = vmov 0   ;;  %v43_v6 = vld [vmem:[%s1510_s0 + $0x10] sm:$0xff]  ;;  %vm171_vm0 = vcmask 261120  }
   0x4   :  { %v78_v2 = vld [vmem:[%s1512_s2 + $0x78] sm:$0xff]  ;;  %963 = vset.pattern.permute.xlu1 %v993_v4  ;;  %962 = vset.pattern.permute.xlu0 %v993_v4  ;;  %v42_v7 = vld [vmem:[%s1510_s0 + $0x8] sm:$0xff]  ;;  %v41_v8 = vld [vmem:[%s1510_s0] sm:$0xff] }
   0x5   :  { %v74_v5 = vld [vmem:[%s1512_s2 + $0x58] sm:$0xff]  ;;  %238 = vmatpush.msra.mxu0 %v44_v1  ;;  %964 = vset.pattern.permute.xlu2 %v993_v4  ;;  %v45_v9 = vld [vmem:[%s1511_s1] sm:$0xff]  ;;  %v77_v10 = vld [vmem:[%s1512_s2 + $0x70] sm:$0xff] }
   0x6   :  { %158 = vperm.xlu0 %962, %v78_v2   ;;  %148 = vperm.xlu1 %963, %v76_v3   ;;  %v75_v11 = vld [vmem:[%s1512_s2 + $0x60] sm:$0xff] }
   0x7   :  { %138 = vperm.xlu2 %964, %v74_v5   ;;  %239 = vmatpush.msra.mxu0 %v43_v6 }
   0x9   :  { %240 = vmatpush.msra.mxu0 %v42_v7 }
   0xb   :  { %241 = vmatpush.msra.mxu0 %v41_v8 }
   0xc   :  { %18 = vsyncpa [#allocation4], 0  ;;  %916 = vmatmul.msk.f32.vlgmr.msra.gmra.mxu0 %vm171_vm0, %v45_v9  ;;  %v73_v12 = vld [vmem:[%s1512_s2 + $0x50] sm:$0xff]  ;;  %v46_v13 = vld [vmem:[%s1511_s1 + $0x8] sm:$0xff]  ;;  %vm459_vm1 = vcmask 130048   ;;  %s907_s18 = sshll.u32 %s1521_s11, 4  ;;  %s908_s18 = int_to_ptr.hbm [resolvable:$true] %s907_s18 }
   0xd   :  { %v72_v14 = vld [vmem:[%s1512_s2 + $0x48] sm:$0xff]  ;;  %v71_v15 = vld [vmem:[%s1512_s2 + $0x40] sm:$0xff]  ;;  %v70_v16 = vld [vmem:[%s1512_s2 + $0x38] sm:$0xff] }
   0xe   :  { %153 = vperm.xlu0 %962, %v77_v10   ;;  %143 = vperm.xlu1 %963, %v75_v11   ;;  %v47_v17 = vld [vmem:[%s1511_s1 + $0x10] sm:$0xff]  ;;  %v68_v19 = vld [vmem:[%s1512_s2 + $0x28] sm:$0xff]  ;;  %v67_v20 = vld [vmem:[%s1512_s2 + $0x20] sm:$0xff] }
   0xf   :  { %133 = vperm.xlu2 %964, %v73_v12   ;;  %v69_v18 = vld [vmem:[%s1512_s2 + $0x30] sm:$0xff]  ;;  %v48_v21 = vld [vmem:[%s1511_s1 + $0x18] sm:$0xff]  ;;  %v80_v22 = vld [vmem:[%s1512_s2 + $0x88] sm:$0xff] }
  0x10   :  { %v66_v23 = vld [vmem:[%s1512_s2 + $0x18] sm:$0xff]  ;;  %v65_v24 = vld [vmem:[%s1512_s2 + $0x10] sm:$0xff]  ;;  %v49_v25 = vld [vmem:[%s1511_s1 + $0x20] sm:$0xff] }
  0x11   :  { %v79_v26 = vld [vmem:[%s1512_s2 + $0x80] sm:$0xff]  ;;  %v64_v27 = vld [vmem:[%s1512_s2 + $0x8] sm:$0xff]  ;;  %v366_v30 = vld [vmem:[%s1514_s4 + $0x78] sm:$0xff] }
  0x12   :  { %v63_v28 = vld [vmem:[%s1512_s2] sm:$0xff]  ;;  %v50_v29 = vld [vmem:[%s1511_s1 + $0x28] sm:$0xff]  ;;  %v365_v31 = vld [vmem:[%s1514_s4 + $0x70] sm:$0xff] }
  0x13   :  { %v364_v32 = vld [vmem:[%s1514_s4 + $0x68] sm:$0xff]  ;;  %v51_v33 = vld [vmem:[%s1511_s1 + $0x30] sm:$0xff]  ;;  %v363_v34 = vld [vmem:[%s1514_s4 + $0x60] sm:$0xff] }
  0x14   :  { %917 = vmatmul.msk.f32.gmra.mxu0 %vm171_vm0, %v46_v13  ;;  %v362_v35 = vld [vmem:[%s1514_s4 + $0x58] sm:$0xff]  ;;  %v361_v36 = vld [vmem:[%s1514_s4 + $0x50] sm:$0xff]  ;;  %v360_v38 = vld [vmem:[%s1514_s4 + $0x48] sm:$0xff] }
  0x15   :  { %v52_v37 = vld [vmem:[%s1511_s1 + $0x38] sm:$0xff]  ;;  %v359_v39 = vld [vmem:[%s1514_s4 + $0x40] sm:$0xff]  ;;  %v357_v42 = vld [vmem:[%s1514_s4 + $0x30] sm:$0xff] }
  0x16   :  { %128 = vperm.xlu0 %962, %v72_v14   ;;  %123 = vperm.xlu1 %963, %v71_v15   ;;  %v358_v40 = vld [vmem:[%s1514_s4 + $0x38] sm:$0xff]  ;;  %v53_v41 = vld [vmem:[%s1511_s1 + $0x40] sm:$0xff]  ;;  %v356_v43 = vld [vmem:[%s1514_s4 + $0x28] sm:$0xff] }
  0x17   :  { %118 = vperm.xlu2 %964, %v70_v16   ;;  %v355_v44 = vld [vmem:[%s1514_s4 + $0x20] sm:$0xff]  ;;  %v54_v45 = vld [vmem:[%s1511_s1 + $0x48] sm:$0xff]  ;;  %v354_v46 = vld [vmem:[%s1514_s4 + $0x18] sm:$0xff] }
  0x18   :  { %v353_v47 = vld [vmem:[%s1514_s4 + $0x10] sm:$0xff]  ;;  %v352_v48 = vld [vmem:[%s1514_s4 + $0x8] sm:$0xff]  ;;  %v351_v50 = vld [vmem:[%s1514_s4] sm:$0xff] }
  0x19   :  { %v55_v49 = vld [vmem:[%s1511_s1 + $0x50] sm:$0xff]  ;;  %v368_v51 = vld [vmem:[%s1514_s4 + $0x88] sm:$0xff]  ;;  %v367_v52 = vld [vmem:[%s1514_s4 + $0x80] sm:$0xff] }
  0x1a   :  { %v56_v53 = vld [vmem:[%s1511_s1 + $0x58] sm:$0xff]  ;;  %v684_v55 = vld [vmem:[%s1516_s6 + $0x10] sm:$0xff]  ;;  %v683_v56 = vld [vmem:[%s1516_s6 + $0x8] sm:$0xff] }
  0x1b   :  { %v685_v54 = vld [vmem:[%s1516_s6 + $0x18] sm:$0xff]  ;;  %v57_v57 = vld [vmem:[%s1511_s1 + $0x60] sm:$0xff]  ;;  %v785_v60 = vld [vmem:[%s1518_s8 + $0x8] sm:$0xff] }
  0x1c   :  { %918 = vmatmul.msk.f32.gmra.mxu0 %vm171_vm0, %v47_v17  ;;  %v682_v58 = vld [vmem:[%s1516_s6] sm:$0xff]  ;;  %v58_v61 = vld [vmem:[%s1511_s1 + $0x68] sm:$0xff]  ;;  %v786_v62 = vld [vmem:[%s1518_s8 + $0x10] sm:$0xff] }
  0x1d   :  { %v784_v59 = vld [vmem:[%s1518_s8] sm:$0xff]  ;;  %v787_v63 = vld [vmem:[%s1518_s8 + $0x18] sm:$0xff]  ;;  %v59_v1 = vld [vmem:[%s1511_s1 + $0x70] sm:$0xff] }
  0x1e   :  { %113 = vperm.xlu0 %962, %v69_v18   ;;  %108 = vperm.xlu1 %963, %v68_v19   ;;  %v853_v0 = vld [vmem:[%s1519_s9] sm:$0xff]  ;;  %v854_v2 = vld [vmem:[%s1519_s9 + $0x8] sm:$0xff]  ;;  %v855_v3 = vld [vmem:[%s1519_s9 + $0x10] sm:$0xff] }
  0x1f   :  { %103 = vperm.xlu2 %964, %v67_v20   ;;  %v856_v4 = vld [vmem:[%s1519_s9 + $0x18] sm:$0xff]  ;;  %v890_v6 = vld [vmem:[#allocation2] sm:$0x1]  ;;  %v62_v10 = vld [vmem:[%s1511_s1 + $0x88] sm:$0xff] }
  0x20   :  { %v60_v5 = vld [vmem:[%s1511_s1 + $0x78] sm:$0xff]  ;;  %v61_v8 = vld [vmem:[%s1511_s1 + $0x80] sm:$0xff] }
  0x24   :  { %919 = vmatmul.msk.f32.gmra.mxu0 %vm171_vm0, %v48_v21 }
  0x26   :  { %168 = vperm.xlu1 %963, %v80_v22   ;;  %98 = vperm.xlu0 %962, %v66_v23  }
  0x27   :  { %93 = vperm.xlu2 %964, %v65_v24  }
  0x2c   :  { %920 = vmatmul.msk.f32.gmra.mxu0 %vm171_vm0, %v49_v25 }
  0x2e   :  { %163 = vperm.xlu0 %962, %v79_v26   ;;  %88 = vperm.xlu1 %963, %v64_v27  }
  0x2f   :  { %83 = vperm.xlu2 %964, %v63_v28  }
  0x34   :  { %921 = vmatmul.msk.f32.gmra.mxu0 %vm171_vm0, %v50_v29 }
  0x36   :  { %446 = vperm.xlu0 %962, %v366_v30   ;;  %441 = vperm.xlu1 %963, %v365_v31  }
  0x37   :  { %436 = vperm.xlu2 %964, %v364_v32  }
  0x3c   :  { %922 = vmatmul.msk.f32.gmra.mxu0 %vm171_vm0, %v51_v33 }
  0x3e   :  { %431 = vperm.xlu0 %962, %v363_v34   ;;  %426 = vperm.xlu1 %963, %v362_v35  }
  0x3f   :  { %421 = vperm.xlu2 %964, %v361_v36  }
  0x44   :  { %923 = vmatmul.msk.f32.gmra.mxu0 %vm171_vm0, %v52_v37 }
  0x46   :  { %416 = vperm.xlu0 %962, %v360_v38   ;;  %411 = vperm.xlu1 %963, %v359_v39  }
  0x47   :  { %406 = vperm.xlu2 %964, %v358_v40  }
  0x4c   :  { %924 = vmatmul.msk.f32.gmra.mxu0 %vm171_vm0, %v53_v41 }
  0x4e   :  { %401 = vperm.xlu0 %962, %v357_v42   ;;  %396 = vperm.xlu1 %963, %v356_v43  }
  0x4f   :  { %391 = vperm.xlu2 %964, %v355_v44  }
  0x54   :  { %925 = vmatmul.msk.f32.gmra.mxu0 %vm171_vm0, %v54_v45 }
  0x56   :  { %386 = vperm.xlu0 %962, %v354_v46   ;;  %381 = vperm.xlu1 %963, %v353_v47  }
  0x57   :  { %376 = vperm.xlu2 %964, %v352_v48  }
  0x5c   :  { %926 = vmatmul.msk.f32.gmra.mxu0 %vm171_vm0, %v55_v49 }
  0x5e   :  { %371 = vperm.xlu0 %962, %v351_v50   ;;  %456 = vperm.xlu1 %963, %v368_v51  }
  0x5f   :  { %451 = vperm.xlu2 %964, %v367_v52  }
  0x61   :  { %v139_v23 = vpop.permute.xlu2 %138 }
  0x64   :  { %927 = vmatmul.msk.f32.gmra.mxu0 %vm171_vm0, %v56_v53 }
  0x66   :  { %703 = vperm.xlu0 %962, %v685_v54   ;;  %698 = vperm.xlu1 %963, %v684_v55  }
  0x67   :  { %693 = vperm.xlu2 %964, %v683_v56  }
  0x69   :  { %v134_v28 = vpop.permute.xlu2 %133 }
  0x6c   :  { %928 = vmatmul.msk.f32.gmra.mxu0 %vm171_vm0, %v57_v57 }
  0x6e   :  { %688 = vperm.xlu0 %962, %v682_v58   ;;  %790 = vperm.xlu1 %963, %v784_v59  }
  0x6f   :  { %795 = vperm.xlu2 %964, %v785_v60  }
  0x71   :  { %v119_v32 = vpop.permute.xlu2 %118 }
  0x74   :  { %929 = vmatmul.msk.f32.gmra.mxu0 %vm171_vm0, %v58_v61 }
  0x76   :  { %800 = vperm.xlu0 %962, %v786_v62   ;;  %805 = vperm.xlu1 %963, %v787_v63  }
  0x77   :  { %859 = vperm.xlu2 %964, %v853_v0  }
  0x78   :  { %v159_v20 = vpop.permute.xlu0 %158  ;;  %v149_v22 = vpop.permute.xlu1 %148 }
  0x79   :  { %v104_v40 = vpop.permute.xlu2 %103 }
  0x7c   :  { %930 = vmatmul.msk.f32.gmra.mxu0 %vm171_vm0, %v59_v1 }
  0x7e   :  { %864 = vperm.xlu0 %962, %v854_v2   ;;  %869 = vperm.xlu1 %963, %v855_v3  }
  0x7f   :  { %874 = vperm.xlu2 %964, %v856_v4  }
  0x80   :  { %v154_v24 = vpop.permute.xlu0 %153  ;;  %v144_v26 = vpop.permute.xlu1 %143 }
  0x81   :  { %v94_v54 = vpop.permute.xlu2 %93 }
  0x84   :  { %931 = vmatmul.msk.f32.gmra.mxu0 %vm171_vm0, %v60_v5  ;;  %v316_v5 = vld [vmem:[%s1513_s3 + $0x8] sm:$0xff] }
  0x86   :  { %893 = vperm.xlu0 %962, %v890_v6  }
  0x88   :  { %v129_v29 = vpop.permute.xlu0 %128  ;;  %v124_v31 = vpop.permute.xlu1 %123 }
  0x89   :  { %v1278_v7 = vpop.f32.mrf.mxu0 }
  0x8c   :  { %932 = vmatmul.msk.f32.gmra.mxu0 %vm171_vm0, %v61_v8 }
  0x90   :  { %v114_v33 = vpop.permute.xlu0 %113  ;;  %v109_v39 = vpop.permute.xlu1 %108 }
  0x91   :  { %v1284_v9 = vpop.f32.mrf.mxu0 }
  0x94   :  { %933 = vmatmul.msk.f32.gmra.mxu0 %vm171_vm0, %v62_v10 }
  0x98   :  { %v99_v43 = vpop.permute.xlu0 %98  ;;  %v169_v53 = vpop.permute.xlu1 %168 }
  0x99   :  { %v1290_v11 = vpop.f32.mrf.mxu0 }
  0xa0   :  { %v164_v57 = vpop.permute.xlu0 %163  ;;  %v89_v10 = vpop.permute.xlu1 %88 }
  0xa1   :  { %v1292_v12 = vpop.f32.mrf.mxu0 }
  0xa2   :  { %v253_v6 = vadd.f32 %v1292_v12, %v99_v43  ;;  %v318_v12 = vld [vmem:[%s1513_s3 + $0x18] sm:$0xff]  ;;  %v337_v43 = vld [vmem:[%s1513_s3 + $0xb0] sm:$0xff] }
  0xa9   :  { %v255_v13 = vpop.f32.mrf.mxu0 }
  0xaa   :  { %v256_v2 = vadd.f32 %v255_v13, %v104_v40  ;;  %v335_v40 = vld [vmem:[%s1513_s3 + $0xa0] sm:$0xff] }
  0xac   :  { %v301_v13 = vmax.f32 %v256_v2, 0.0  ;;  %v347_v2 = vld [vmem:[%s1513_s3 + $0x100] sm:$0xff] }
  0xb1   :  { %v258_v14 = vpop.f32.mrf.mxu0 }
  0xb2   :  { %v259_v63 = vadd.f32 %v258_v14, %v109_v39  ;;  %v250_v14 = vadd.f32 %v1290_v11, %v94_v54  ;;  %v1375_v39 = vpop.permute.xlu0 %446  ;;  %v343_v54 = vld [vmem:[%s1513_s3 + $0xe0] sm:$0xff] }
  0xb4   :  { %v302_v8 = vmax.f32 %v259_v63, 0.0 }
  0xb9   :  { %v261_v15 = vpop.f32.mrf.mxu0 }
  0xba   :  { %v262_v59 = vadd.f32 %v261_v15, %v114_v33  ;;  %v84_v15 = vpop.permute.xlu2 %83  ;;  %v329_v33 = vld [vmem:[%s1513_s3 + $0x70] sm:$0xff] }
  0xbc   :  { %v303_v3 = vmax.f32 %v262_v59, 0.0  ;;  %v345_v59 = vld [vmem:[%s1513_s3 + $0xf0] sm:$0xff] }
  0xc1   :  { %v264_v16 = vpop.f32.mrf.mxu0 }
  0xc2   :  { %v265_v55 = vadd.f32 %v264_v16, %v119_v32  ;;  %v247_v16 = vadd.f32 %v1284_v9, %v89_v10  ;;  %v315_v9 = vld [vmem:[%s1513_s3] sm:$0xff]  ;;  %v332_v32 = vld [vmem:[%s1513_s3 + $0x88] sm:$0xff] }
  0xc4   :  { %v304_v0 = vmax.f32 %v265_v55, 0.0 }
  0xc9   :  { %v267_v17 = vpop.f32.mrf.mxu0 }
  0xca   :  { %v268_v51 = vadd.f32 %v267_v17, %v124_v31  ;;  %v300_v17 = vmax.f32 %v253_v6, 0.0  ;;  %v327_v31 = vld [vmem:[%s1513_s3 + $0x60] sm:$0xff] }
  0xcc   :  { %v305_v60 = vmax.f32 %v268_v51, 0.0 }
  0xd1   :  { %v270_v18 = vpop.f32.mrf.mxu0 }
  0xd2   :  { %v271_v49 = vadd.f32 %v270_v18, %v129_v29  ;;  %v244_v18 = vadd.f32 %v1278_v7, %v84_v15  ;;  %v320_v7 = vld [vmem:[%s1513_s3 + $0x28] sm:$0xff]  ;;  %v325_v29 = vld [vmem:[%s1513_s3 + $0x50] sm:$0xff] }
  0xd4   :  { %v306_v56 = vmax.f32 %v271_v49, 0.0  ;;  %v297_v11 = vmax.f32 %v244_v18, 0.0  ;;  %v1405_v49 = vpop.permute.xlu1 %441 }
  0xd9   :  { %v273_v19 = vpop.f32.mrf.mxu0 }
  0xda   :  { %v274_v47 = vadd.f32 %v273_v19, %v134_v28  ;;  %v299_v19 = vmax.f32 %v250_v14, 0.0  ;;  %v328_v28 = vld [vmem:[%s1513_s3 + $0x68] sm:$0xff]  ;;  %v349_v14 = vld [vmem:[%s1513_s3 + $0x110] sm:$0xff] }
  0xdc   :  { %v307_v52 = vmax.f32 %v274_v47, 0.0  ;;  %v1419_v55 = vpop.permute.xlu1 %426 }
  0xe1   :  { %v276_v21 = vpop.f32.mrf.mxu0 }
  0xe2   :  { %v277_v44 = vadd.f32 %v276_v21, %v139_v23  ;;  %v317_v21 = vld [vmem:[%s1513_s3 + $0x10] sm:$0xff]  ;;  %v319_v23 = vld [vmem:[%s1513_s3 + $0x20] sm:$0xff] }
  0xe4   :  { %v308_v50 = vmax.f32 %v277_v44, 0.0  ;;  %v342_v44 = vld [vmem:[%s1513_s3 + $0xd8] sm:$0xff] }
  0xe9   :  { %v279_v25 = vpop.f32.mrf.mxu0 }
  0xea   :  { %v280_v41 = vadd.f32 %v279_v25, %v144_v26  ;;  %v321_v25 = vld [vmem:[%s1513_s3 + $0x30] sm:$0xff]  ;;  %v326_v26 = vld [vmem:[%s1513_s3 + $0x58] sm:$0xff] }
  0xec   :  { %v309_v48 = vmax.f32 %v280_v41, 0.0  ;;  %v340_v41 = vld [vmem:[%s1513_s3 + $0xc8] sm:$0xff] }
  0xf1   :  { %v282_v27 = vpop.f32.mrf.mxu0 }
  0xf2   :  { %v283_v37 = vadd.f32 %v282_v27, %v149_v22  ;;  %v322_v22 = vld [vmem:[%s1513_s3 + $0x38] sm:$0xff]  ;;  %v323_v27 = vld [vmem:[%s1513_s3 + $0x40] sm:$0xff] }
  0xf4   :  { %v310_v45 = vmax.f32 %v283_v37, 0.0  ;;  %v333_v37 = vld [vmem:[%s1513_s3 + $0x90] sm:$0xff] }
  0xf9   :  { %v285_v30 = vpop.f32.mrf.mxu0 }
  0xfa   :  { %v286_v35 = vadd.f32 %v285_v30, %v154_v24  ;;  %v324_v24 = vld [vmem:[%s1513_s3 + $0x48] sm:$0xff]  ;;  %v330_v30 = vld [vmem:[%s1513_s3 + $0x78] sm:$0xff] }
  0xfc   :  { %v311_v42 = vmax.f32 %v286_v35, 0.0  ;;  %v331_v35 = vld [vmem:[%s1513_s3 + $0x80] sm:$0xff] }
 0x101   :  { %v288_v34 = vpop.f32.mrf.mxu0 }
 0x102   :  { %v289_v36 = vadd.f32 %v288_v34, %v159_v20  ;;  %v298_v20 = vmax.f32 %v247_v16, 0.0  ;;  %v334_v34 = vld [vmem:[%s1513_s3 + $0x98] sm:$0xff] }
 0x104   :  { %v312_v38 = vmax.f32 %v289_v36, 0.0  ;;  %v336_v36 = vld [vmem:[%s1513_s3 + $0xa8] sm:$0xff] }
 0x106   :  { %514 = vmatpush.msra.mxu1 %v312_v38  ;;  %v338_v38 = vld [vmem:[%s1513_s3 + $0xb8] sm:$0xff] }
 0x108   :  { %515 = vmatpush.msra.mxu1 %v311_v42  ;;  %v1385_v42 = vpop.permute.xlu0 %431 }
 0x109   :  { %v291_v46 = vpop.f32.mrf.mxu0 }
 0x10a   :  { %516 = vmatpush.msra.mxu1 %v310_v45  ;;  %v292_v61 = vadd.f32 %v291_v46, %v164_v57  ;;  %v1394_v45 = vpop.permute.xlu2 %436  ;;  %v339_v46 = vld [vmem:[%s1513_s3 + $0xc0] sm:$0xff]  ;;  %v348_v57 = vld [vmem:[%s1513_s3 + $0x108] sm:$0xff] }
 0x10c   :  { %517 = vmatpush.msra.mxu1 %v309_v48  ;;  %v313_v4 = vmax.f32 %v292_v61, 0.0  ;;  %v344_v48 = vld [vmem:[%s1513_s3 + $0xe8] sm:$0xff]  ;;  %v412_v61 = vpop.permute.xlu1 %411 }
 0x10e   :  { %518 = vmatpush.msra.mxu1 %v308_v50  ;;  %v341_v50 = vld [vmem:[%s1513_s3 + $0xd0] sm:$0xff] }
 0x110   :  { %519 = vmatpush.msra.mxu1 %v307_v52  ;;  %v1399_v47 = vpop.permute.xlu0 %416 }
 0x111   :  { %v294_v58 = vpop.f32.mrf.mxu0 }
 0x112   :  { %520 = vmatpush.msra.mxu1 %v306_v56  ;;  %v295_v62 = vadd.f32 %v294_v58, %v169_v53  ;;  %v1410_v51 = vpop.permute.xlu2 %421  ;;  %v346_v53 = vld [vmem:[%s1513_s3 + $0xf8] sm:$0xff] }
 0x114   :  { %521 = vmatpush.msra.mxu1 %v305_v60  ;;  %v314_v1 = vmax.f32 %v295_v62, 0.0  ;;  %v350_v62 = vld [vmem:[%s1513_s3 + $0x118] sm:$0xff]  ;;  %v397_v6 = vpop.permute.xlu1 %396 }
 0x116   :  { %522 = vmatpush.msra.mxu1 %v304_v0  ;;  %599 = vmatpush.msra.mxu2 %v314_v1 }
 0x118   :  { %523 = vmatpush.msra.mxu1 %v303_v3  ;;  %600 = vmatpush.msra.mxu2 %v313_v4  ;;  %v402_v52 = vpop.permute.xlu0 %401 }
 0x119   :  { %934 = vmatmul.msk.f32.vlgmr.msra.gmra.mxu2 %vm459_vm1, %v316_v5 }
 0x11a   :  { %524 = vmatpush.msra.mxu1 %v302_v8  ;;  %v407_v56 = vpop.permute.xlu2 %406 }
 0x11c   :  { %525 = vmatpush.msra.mxu1 %v301_v13 }
 0x11e   :  { %526 = vmatpush.msra.mxu1 %v300_v17  ;;  %v382_v17 = vpop.permute.xlu1 %381 }
 0x120   :  { %527 = vmatpush.msra.mxu1 %v299_v19  ;;  %v387_v58 = vpop.permute.xlu0 %386 }
 0x121   :  { %935 = vmatmul.msk.f32.gmra.mxu2 %vm459_vm1, %v318_v12 }
 0x122   :  { %528 = vmatpush.msra.mxu1 %v298_v20  ;;  %v392_v63 = vpop.permute.xlu2 %391 }
 0x124   :  { %529 = vmatpush.msra.mxu1 %v297_v11 }
 0x125   :  { %530 = vmatmul.f32.vlgmr.msra.gmra.mxu1 %v315_v9 }
 0x128   :  { %v372_v0 = vpop.permute.xlu0 %371 }
 0x129   :  { %936 = vmatmul.msk.f32.gmra.mxu2 %vm459_vm1, %v320_v7 }
 0x12a   :  { %v377_v8 = vpop.permute.xlu2 %376 }
 0x12d   :  { %533 = vmatmul.f32.gmra.mxu1 %v317_v21 }
 0x131   :  { %937 = vmatmul.msk.f32.gmra.mxu2 %vm459_vm1, %v322_v22 }
 0x135   :  { %536 = vmatmul.f32.gmra.mxu1 %v319_v23 }
 0x139   :  { %938 = vmatmul.msk.f32.gmra.mxu2 %vm459_vm1, %v324_v24 }
 0x13d   :  { %539 = vmatmul.f32.gmra.mxu1 %v321_v25 }
 0x141   :  { %939 = vmatmul.msk.f32.gmra.mxu2 %vm459_vm1, %v326_v26 }
 0x145   :  { %542 = vmatmul.f32.gmra.mxu1 %v323_v27 }
 0x149   :  { %940 = vmatmul.msk.f32.gmra.mxu2 %vm459_vm1, %v328_v28 }
 0x14d   :  { %545 = vmatmul.f32.gmra.mxu1 %v325_v29 }
 0x151   :  { %941 = vmatmul.msk.f32.gmra.mxu2 %vm459_vm1, %v330_v30 }
 0x155   :  { %548 = vmatmul.f32.gmra.mxu1 %v327_v31 }
 0x159   :  { %942 = vmatmul.msk.f32.gmra.mxu2 %vm459_vm1, %v332_v32 }
 0x15d   :  { %551 = vmatmul.f32.gmra.mxu1 %v329_v33 }
 0x161   :  { %943 = vmatmul.msk.f32.gmra.mxu2 %vm459_vm1, %v334_v34 }
 0x165   :  { %554 = vmatmul.f32.gmra.mxu1 %v331_v35 }
 0x169   :  { %944 = vmatmul.msk.f32.gmra.mxu2 %vm459_vm1, %v336_v36 }
 0x16d   :  { %557 = vmatmul.f32.gmra.mxu1 %v333_v37 }
 0x171   :  { %945 = vmatmul.msk.f32.gmra.mxu2 %vm459_vm1, %v338_v38 }
 0x175   :  { %560 = vmatmul.f32.gmra.mxu1 %v335_v40 }
 0x179   :  { %946 = vmatmul.msk.f32.gmra.mxu2 %vm459_vm1, %v340_v41 }
 0x17d   :  { %563 = vmatmul.f32.gmra.mxu1 %v337_v43 }
 0x181   :  { %947 = vmatmul.msk.f32.gmra.mxu2 %vm459_vm1, %v342_v44 }
 0x185   :  { %566 = vmatmul.f32.gmra.mxu1 %v339_v46 }
 0x189   :  { %948 = vmatmul.msk.f32.gmra.mxu2 %vm459_vm1, %v344_v48 }
 0x18d   :  { %569 = vmatmul.f32.gmra.mxu1 %v341_v50 }
 0x191   :  { %949 = vmatmul.msk.f32.gmra.mxu2 %vm459_vm1, %v346_v53 }
 0x195   :  { %572 = vmatmul.f32.gmra.mxu1 %v343_v54 }
 0x199   :  { %950 = vmatmul.msk.f32.gmra.mxu2 %vm459_vm1, %v348_v57 }
 0x19c   :  { %v602_v60 = vpop.f32.mrf.mxu2 }
 0x19d   :  { %575 = vmatmul.f32.gmra.mxu1 %v345_v59 }
 0x1a1   :  { %951 = vmatmul.msk.f32.gmra.mxu2 %vm459_vm1, %v350_v62 }
 0x1a2   :  { %v531_v1 = vpop.f32.mrf.mxu1 }
 0x1a3   :  { %v532_v3 = vadd.f32 %v531_v1, %v372_v0 }
 0x1a4   :  { %v605_v4 = vpop.f32.mrf.mxu2 }
 0x1a5   :  { %v1435_v5 = vadd.f32 %v602_v60, %v532_v3  ;;  %578 = vmatmul.f32.gmra.mxu1 %v347_v2 }
 0x1aa   :  { %v534_v10 = vpop.f32.mrf.mxu1 }
 0x1ab   :  { %v535_v13 = vadd.f32 %v534_v10, %v377_v8 }
 0x1ac   :  { %v608_v15 = vpop.f32.mrf.mxu2 }
 0x1ad   :  { %v1440_v16 = vadd.f32 %v605_v4, %v535_v13  ;;  %581 = vmatmul.f32.gmra.mxu1 %v349_v14 }
 0x1b2   :  { %v537_v18 = vpop.f32.mrf.mxu1 }
 0x1b3   :  { %v538_v19 = vadd.f32 %v537_v18, %v382_v17 }
 0x1b4   :  { %v611_v12 = vpop.f32.mrf.mxu2 }
 0x1b5   :  { %v1442_v20 = vadd.f32 %v608_v15, %v538_v19 }
 0x1ba   :  { %v540_v11 = vpop.f32.mrf.mxu1 }
 0x1bb   :  { %v541_v9 = vadd.f32 %v540_v11, %v387_v58 }
 0x1bc   :  { %v614_v7 = vpop.f32.mrf.mxu2 }
 0x1bd   :  { %v1444_v21 = vadd.f32 %v611_v12, %v541_v9 }
 0x1c2   :  { %v543_v22 = vpop.f32.mrf.mxu1 }
 0x1c3   :  { %v544_v23 = vadd.f32 %v543_v22, %v392_v63 }
 0x1c4   :  { %v617_v24 = vpop.f32.mrf.mxu2 }
 0x1c5   :  { %v1446_v25 = vadd.f32 %v614_v7, %v544_v23 }
 0x1c7   :  { %v660_v23 = vmax.f32 %v1446_v25, 0.0 }
 0x1ca   :  { %v546_v26 = vpop.f32.mrf.mxu1 }
 0x1cb   :  { %v547_v27 = vadd.f32 %v546_v26, %v397_v6  ;;  %v659_v26 = vmax.f32 %v1444_v21, 0.0  ;;  %v674_v21 = vld [vmem:[%s1515_s5] sm:$0xff] }
 0x1cc   :  { %v620_v28 = vpop.f32.mrf.mxu2 }
 0x1cd   :  { %v1448_v29 = vadd.f32 %v617_v24, %v547_v27  ;;  %v457_v24 = vpop.permute.xlu1 %456 }
 0x1cf   :  { %v661_v7 = vmax.f32 %v1448_v29, 0.0  ;;  %v656_v29 = vmax.f32 %v1435_v5, 0.0  ;;  %v678_v5 = vld [vmem:[%s1515_s5 + $0x20] sm:$0xff] }
 0x1d2   :  { %v549_v30 = vpop.f32.mrf.mxu1 }
 0x1d3   :  { %v550_v31 = vadd.f32 %v549_v30, %v402_v52 }
 0x1d4   :  { %v623_v32 = vpop.f32.mrf.mxu2 }
 0x1d5   :  { %v621_v33 = vadd.f32 %v620_v28, %v550_v31  ;;  %v452_v28 = vpop.permute.xlu2 %451  ;;  %v658_v31 = vmax.f32 %v1442_v20, 0.0  ;;  %v680_v20 = vld [vmem:[%s1515_s5 + $0x30] sm:$0xff] }
 0x1da   :  { %v552_v34 = vpop.f32.mrf.mxu1 }
 0x1db   :  { %v553_v35 = vadd.f32 %v552_v34, %v407_v56 }
 0x1dc   :  { %v626_v36 = vpop.f32.mrf.mxu2 }
 0x1dd   :  { %v624_v37 = vadd.f32 %v623_v32, %v553_v35 }
 0x1df   :  { %v663_v9 = vmax.f32 %v624_v37, 0.0  ;;  %v675_v37 = vld [vmem:[%s1515_s5 + $0x8] sm:$0xff] }
 0x1e2   :  { %v555_v38 = vpop.f32.mrf.mxu1 }
 0x1e3   :  { %v556_v40 = vadd.f32 %v555_v38, %v412_v61  ;;  %v677_v38 = vld [vmem:[%s1515_s5 + $0x18] sm:$0xff] }
 0x1e4   :  { %v629_v41 = vpop.f32.mrf.mxu2 }
 0x1e5   :  { %v627_v43 = vadd.f32 %v626_v36, %v556_v40  ;;  %v679_v40 = vld [vmem:[%s1515_s5 + $0x28] sm:$0xff] }
 0x1ea   :  { %v558_v44 = vpop.f32.mrf.mxu1 }
 0x1ec   :  { %v632_v46 = vpop.f32.mrf.mxu2 }
 0x1f2   :  { %v561_v48 = vpop.f32.mrf.mxu1 }
 0x1f3   :  { %v562_v10 = vadd.f32 %v561_v48, %v1410_v51  ;;  %v664_v51 = vmax.f32 %v627_v43, 0.0 }
 0x1f4   :  { %v635_v50 = vpop.f32.mrf.mxu2 }
 0x1fa   :  { %v564_v53 = vpop.f32.mrf.mxu1 }
 0x1fb   :  { %v565_v4 = vadd.f32 %v564_v53, %v1419_v55 }
 0x1fc   :  { %v638_v54 = vpop.f32.mrf.mxu2 }
 0x1fd   :  { %v636_v15 = vadd.f32 %v635_v50, %v565_v4 }
 0x1ff   :  { %v667_v18 = vmax.f32 %v636_v15, 0.0  ;;  %v783_v15 = vld [vmem:[%s1517_s7 + $0x18] sm:$0xff] }
 0x202   :  { %v567_v57 = vpop.f32.mrf.mxu1 }
 0x203   :  { %v568_v1 = vadd.f32 %v567_v57, %v1385_v42 }
 0x204   :  { %v641_v58 = vpop.f32.mrf.mxu2 }
 0x205   :  { %v639_v14 = vadd.f32 %v638_v54, %v568_v1  ;;  %v704_v54 = vpop.permute.xlu0 %703 }
 0x20a   :  { %v570_v59 = vpop.f32.mrf.mxu1 }
 0x20b   :  { %v571_v0 = vadd.f32 %v570_v59, %v1394_v45  ;;  %v633_v45 = vadd.f32 %v632_v46, %v562_v10 }
 0x20c   :  { %v644_v52 = vpop.f32.mrf.mxu2 }
 0x20d   :  { %v642_v6 = vadd.f32 %v641_v58, %v571_v0  ;;  %v666_v19 = vmax.f32 %v633_v45, 0.0  ;;  %v699_v58 = vpop.permute.xlu1 %698 }
 0x20f   :  { %v669_v17 = vmax.f32 %v642_v6, 0.0 }
 0x212   :  { %v573_v60 = vpop.f32.mrf.mxu1 }
 0x213   :  { %v574_v62 = vadd.f32 %v573_v60, %v1405_v49  ;;  %v559_v49 = vadd.f32 %v558_v44, %v1399_v47  ;;  %v662_v47 = vmax.f32 %v621_v33, 0.0  ;;  %v657_v33 = vmax.f32 %v1440_v16, 0.0  ;;  %v676_v16 = vld [vmem:[%s1515_s5 + $0x10] sm:$0xff]  ;;  %v694_v60 = vpop.permute.xlu2 %693 }
 0x214   :  { %v647_v63 = vpop.f32.mrf.mxu2 }
 0x215   :  { %v645_v2 = vadd.f32 %v644_v52, %v574_v62  ;;  %v630_v42 = vadd.f32 %v629_v41, %v559_v49  ;;  %v681_v41 = vld [vmem:[%s1515_s5 + $0x38] sm:$0xff]  ;;  %v782_v49 = vld [vmem:[%s1517_s7 + $0x10] sm:$0xff]  ;;  %v791_v45 = vpop.permute.xlu1 %790 }
 0x217   :  { %v670_v13 = vmax.f32 %v645_v2, 0.0  ;;  %v665_v12 = vmax.f32 %v630_v42, 0.0 }
 0x21a   :  { %v576_v56 = vpop.f32.mrf.mxu1 }
 0x21b   :  { %v577_v61 = vadd.f32 %v576_v56, %v1375_v39  ;;  %v668_v39 = vmax.f32 %v639_v14, 0.0  ;;  %v780_v14 = vld [vmem:[%s1517_s7] sm:$0xff] }
 0x21c   :  { %v650_v11 = vpop.f32.mrf.mxu2 }
 0x21d   :  { %v648_v3 = vadd.f32 %v647_v63, %v577_v61  ;;  %v689_v61 = vpop.permute.xlu0 %688 }
 0x21f   :  { %v671_v8 = vmax.f32 %v648_v3, 0.0 }
 0x221   :  { %718 = vmatpush.msra.mxu3 %v671_v8 }
 0x222   :  { %v579_v55 = vpop.f32.mrf.mxu1 }
 0x223   :  { %719 = vmatpush.msra.mxu3 %v670_v13  ;;  %v580_v32 = vadd.f32 %v579_v55, %v452_v28  ;;  %v781_v13 = vld [vmem:[%s1517_s7 + $0x8] sm:$0xff]  ;;  %s994_s7 = smov [#allocation3]  }
 0x224   :  { %v653_v30 = vpop.f32.mrf.mxu2  ;;  %s905_s15 = sshll.u32 %s994_s7, 4  ;;  %s906_s15 = int_to_ptr.vmem [resolvable:$true] %s905_s15 }
 0x225   :  { %720 = vmatpush.msra.mxu3 %v669_v17  ;;  %v651_v35 = vadd.f32 %v650_v11, %v580_v32 }
 0x227   :  { %721 = vmatpush.msra.mxu3 %v668_v39  ;;  %v672_v36 = vmax.f32 %v651_v35, 0.0  ;;  %v796_v39 = vpop.permute.xlu2 %795 }
 0x229   :  { %722 = vmatpush.msra.mxu3 %v667_v18  ;;  %v801_v18 = vpop.permute.xlu0 %800 }
 0x22a   :  { %v582_v22 = vpop.f32.mrf.mxu1 }
 0x22b   :  { %723 = vmatpush.msra.mxu3 %v666_v19  ;;  %v583_v27 = vadd.f32 %v582_v22, %v457_v24  ;;  %v806_v19 = vpop.permute.xlu1 %805 }
 0x22d   :  { %724 = vmatpush.msra.mxu3 %v665_v12  ;;  %v654_v34 = vadd.f32 %v653_v30, %v583_v27 }
 0x22f   :  { %725 = vmatpush.msra.mxu3 %v664_v51  ;;  %v673_v25 = vmax.f32 %v654_v34, 0.0 }
 0x231   :  { %726 = vmatpush.msra.mxu3 %v663_v9  ;;  %v860_v9 = vpop.permute.xlu2 %859 }
 0x233   :  { %727 = vmatpush.msra.mxu3 %v662_v47 }
 0x235   :  { %728 = vmatpush.msra.mxu3 %v661_v7 }
 0x237   :  { %729 = vmatpush.msra.mxu3 %v660_v23  ;;  %v865_v23 = vpop.permute.xlu0 %864 }
 0x239   :  { %730 = vmatpush.msra.mxu3 %v659_v26  ;;  %v870_v26 = vpop.permute.xlu1 %869  ;;  %v875_v34 = vpop.permute.xlu2 %874 }
 0x23b   :  { %731 = vmatpush.msra.mxu3 %v658_v31 }
 0x23d   :  { %732 = vmatpush.msra.mxu3 %v657_v33 }
 0x23f   :  { %733 = vmatpush.msra.mxu3 %v656_v29 }
 0x240   :  { %734 = vmatmul.f32.vlgmr.msra.gmra.mxu3 %v674_v21 }
 0x241   :  { %761 = vmatpush.msrb.mxu3 %v673_v25 }
 0x243   :  { %762 = vmatpush.msrb.mxu3 %v672_v36 }
 0x248   :  { %737 = vmatmul.f32.gmra.mxu3 %v676_v16 }
 0x250   :  { %740 = vmatmul.f32.gmra.mxu3 %v678_v5 }
 0x258   :  { %743 = vmatmul.f32.gmra.mxu3 %v680_v20  ;;  %v894_v20 = vpop.permute.xlu0 %893 }
 0x260   :  { %952 = vmatmul.msk.f32.vlgmr.msrb.gmra.mxu3 %vm459_vm1, %v675_v37 }
 0x268   :  { %953 = vmatmul.msk.f32.gmra.mxu3 %vm459_vm1, %v677_v38  ;;  %v896_v38 = vperm.slane %v894_v20, 0 }
 0x270   :  { %954 = vmatmul.msk.f32.gmra.mxu3 %vm459_vm1, %v679_v40 }
 0x278   :  { %955 = vmatmul.msk.f32.gmra.mxu3 %vm459_vm1, %v681_v41 }
 0x2c3   :  { %v735_v43 = vpop.f32.mrf.mxu3 }
 0x2c4   :  { %v736_v1 = vadd.f32 %v735_v43, %v689_v61 }
 0x2cb   :  { %v738_v44 = vpop.f32.mrf.mxu3 }
 0x2cc   :  { %v739_v56 = vadd.f32 %v738_v44, %v694_v60 }
 0x2d3   :  { %v741_v46 = vpop.f32.mrf.mxu3 }
 0x2d4   :  { %v742_v59 = vadd.f32 %v741_v46, %v699_v58 }
 0x2db   :  { %v744_v48 = vpop.f32.mrf.mxu3 }
 0x2dc   :  { %v745_v52 = vadd.f32 %v744_v48, %v704_v54 }
 0x2e3   :  { %v764_v50 = vpop.f32.mrf.mxu3 }
 0x2e4   :  { %v765_v4 = vadd.f32 %v764_v50, %v736_v1 }
 0x2e6   :  { %v776_v10 = vmax.f32 %v765_v4, 0.0 }
 0x2eb   :  { %v767_v53 = vpop.f32.mrf.mxu3 }
 0x2ec   :  { %v768_v2 = vadd.f32 %v767_v53, %v739_v56 }
 0x2ee   :  { %v777_v8 = vmax.f32 %v768_v2, 0.0 }
 0x2f3   :  { %v770_v57 = vpop.f32.mrf.mxu3 }
 0x2f4   :  { %v771_v63 = vadd.f32 %v770_v57, %v742_v59 }
 0x2f6   :  { %v778_v6 = vmax.f32 %v771_v63, 0.0 }
 0x2fb   :  { %v773_v62 = vpop.f32.mrf.mxu3 }
 0x2fc   :  { %v774_v0 = vadd.f32 %v773_v62, %v745_v52 }
 0x2fe   :  { %v779_v3 = vmax.f32 %v774_v0, 0.0 }
 0x300   :  { %832 = vmatpush.msra.mxu3 %v779_v3 }
 0x302   :  { %833 = vmatpush.msra.mxu3 %v778_v6 }
 0x304   :  { %834 = vmatpush.msra.mxu3 %v777_v8 }
 0x306   :  { %835 = vmatpush.msra.mxu3 %v776_v10 }
 0x307   :  { %956 = vmatmul.msk.f32.vlgmr.msra.gmra.mxu3 %vm171_vm0, %v780_v14 }
 0x30f   :  { %957 = vmatmul.msk.f32.gmra.mxu3 %vm171_vm0, %v781_v13 }
 0x317   :  { %958 = vmatmul.msk.f32.gmra.mxu3 %vm171_vm0, %v782_v49 }
 0x31f   :  { %959 = vmatmul.msk.f32.gmra.mxu3 %vm171_vm0, %v783_v15 }
 0x38a   :  { %v837_v17 = vpop.f32.mrf.mxu3 }
 0x38b   :  { %v838_v51 = vadd.f32 %v837_v17, %v791_v45 }
 0x38d   :  { %v849_v7 = vmax.f32 %v838_v51, 0.0 }
 0x38f   :  { %v877_v28 = vmul.f32 %v860_v9, %v849_v7 }
 0x392   :  { %v840_v42 = vpop.f32.mrf.mxu3 }
 0x393   :  { %v841_v55 = vadd.f32 %v840_v42, %v796_v39 }
 0x395   :  { %v850_v47 = vmax.f32 %v841_v55, 0.0 }
 0x397   :  { %v878_v24 = vmul.f32 %v865_v23, %v850_v47 }
 0x399   :  { %v881_v32 = vadd.f32 %v878_v24, %v877_v28 }
 0x39a   :  { %v843_v12 = vpop.f32.mrf.mxu3 }
 0x39b   :  { %v844_v11 = vadd.f32 %v843_v12, %v801_v18 }
 0x39d   :  { %v851_v22 = vmax.f32 %v844_v11, 0.0 }
 0x39f   :  { %v879_v30 = vmul.f32 %v870_v26, %v851_v22 }
 0x3a1   :  { %v882_v29 = vadd.f32 %v881_v32, %v879_v30 }
 0x3a2   :  { %v846_v27 = vpop.f32.mrf.mxu3 }
 0x3a3   :  { %v847_v31 = vadd.f32 %v846_v27, %v806_v19 }
 0x3a5   :  { %v852_v33 = vmax.f32 %v847_v31, 0.0 }
 0x3a7   :  { %v880_v35 = vmul.f32 %v875_v34, %v852_v33 }
 0x3a9   :  { %v883_v21 = vadd.f32 %v882_v29, %v880_v35 }
 0x3ab   :  { %v884_v25 = vrot.slane %v883_v21, 4 }
 0x3ad   :  { %v885_v36 = vadd.f32 %v884_v25, %v883_v21 }
 0x3af   :  { %v886_v16 = vrot.slane %v885_v36, 2 }
 0x3b1   :  { %v887_v5 = vadd.f32 %v886_v16, %v885_v36 }
 0x3b3   :  { %v888_v37 = vrot.slane %v887_v5, 1 }
 0x3b5   :  { %v889_v40 = vadd.f32 %v888_v37, %v887_v5 }
 0x3b7   :  { %v897_v41 = vadd.f32 %v896_v38, %v889_v40 }
 0x3b9   :  { %965 = vtanh.f32 %v897_v41 }
 0x3bf   :  { %v966_v43 = vpop.eup %965 }
 0x3c0   :  { %899 = vst [vmem:[#allocation3] sm:$0x1] %v966_v43 }
 0x3c1   :  { %910 = dma.vmem_to_hbm [thread:$0]  %s906_s15, 16, %s908_s18, [#allocation4]  }
 0x3c2   :  { %991 = dma.done.wait [#allocation4], 16  }
 0x3c3   :  { %992 = vsyncadd [#allocation4], 4294967280 }
 0x3c4   :  { %915 = vsyncpa [#allocation4], 1 }

</bundles_post_ra>
